<compile_context>
chip_gen: v7x
topology: tpu7x:2x2x1
jax: 0.10.0
libtpu: 0.0.40
codegen_flags: <defaults>
</compile_context>

<pallas_src>
import jax
import jax.numpy as jnp
from jax.experimental import pallas as pl
from jax.experimental.pallas import tpu as pltpu

LANE = 128
NEG_SLOPE = 0.01  # PyTorch F.leaky_relu default


def _round_up(n, m):
    return ((n + m - 1) // m) * m


def qnet_kernel(x_ref, w1_ref, b1_ref, w2_ref, b2_ref, w3_ref, b3_ref, o_ref):
    mm_dtype = w1_ref.dtype  # bf16 (default) or f32 matmul operands
    x = x_ref[...].astype(mm_dtype)
    # fc1 + leaky_relu  (MXU: f32 accumulate; VPU elementwise in f32)
    h1 = jnp.dot(x, w1_ref[...], preferred_element_type=jnp.float32) + b1_ref[...]
    h1 = jnp.where(h1 > 0, h1, NEG_SLOPE * h1)
    # fc2 + leaky_relu
    h2 = (jnp.dot(h1.astype(mm_dtype), w2_ref[...],
                  preferred_element_type=jnp.float32) + b2_ref[...])
    h2 = jnp.where(h2 > 0, h2, NEG_SLOPE * h2)
    # fc3 (no activation) -- natural (tb, action_size) store
    o_ref[...] = (jnp.dot(h2.astype(mm_dtype), w3_ref[...],
                          preferred_element_type=jnp.float32)
                  + b3_ref[...]).astype(o_ref.dtype)


def prepare_params(w1, b1, w2, b2, w3, b3, *, use_bf16=True):
    """One-time parameter preparation (do NOT call per forward).

    Pads the hidden dim to 128 lanes and optionally casts matmul weights to bf16.
    Biases stay f32 (elementwise math in the kernel is f32).
    w*: (in, out), i.e. transposed relative to PyTorch nn.Linear.weight.
    """
    state_size, hidden = w1.shape
    action_size = w3.shape[1]
    h_pad = _round_up(hidden, LANE)
    wd = jnp.bfloat16 if use_bf16 else jnp.float32
    f32 = jnp.float32
    w1_p = jnp.zeros((state_size, h_pad), wd).at[:, :hidden].set(w1.astype(wd))
    b1_p = jnp.zeros((1, h_pad), f32).at[0, :hidden].set(b1.astype(f32))
    w2_p = jnp.zeros((h_pad, h_pad), wd).at[:hidden, :hidden].set(w2.astype(wd))
    b2_p = jnp.zeros((1, h_pad), f32).at[0, :hidden].set(b2.astype(f32))
    w3_p = jnp.zeros((h_pad, action_size), wd).at[:hidden, :].set(w3.astype(wd))
    b3_p = jnp.zeros((1, action_size), f32).at[0, :].set(b3.astype(f32))
    return (w1_p, b1_p, w2_p, b2_p, w3_p, b3_p)


def qnetwork_forward(state, params, *, block_batch=1024):
    """state: (batch, state_size) f32; params: output of prepare_params()."""
    w1_p, b1_p, w2_p, b2_p, w3_p, b3_p = params
    batch, state_size = state.shape
    assert w1_p.shape[0] == state_size
    h_pad = w1_p.shape[1]
    action_size = w3_p.shape[1]

    # Batch tiling: no batch padding.  Aim for >=2 grid steps whenever batch > 8
    # (v7x megacore sharding); cap the tile at block_batch rows.
    if batch <= 8:
        tb = _round_up(batch, 8)
    else:
        tb = min(block_batch, _round_up(pl.cdiv(batch, 2), 8))
    grid = (pl.cdiv(batch, tb),)

    def resident(i):          # weights/biases: same block every step -> stay in VMEM
        return (0, 0)

    flops = 2 * batch * (state_size * h_pad + h_pad * h_pad + h_pad * action_size)
    wbytes = (w1_p.size + w2_p.size + w3_p.size) * w1_p.dtype.itemsize
    bytes_accessed = (4 * batch * (state_size + action_size) + wbytes
                      + 4 * (2 * h_pad + action_size))

    return pl.pallas_call(
        qnet_kernel,
        out_shape=jax.ShapeDtypeStruct((batch, action_size), jnp.float32),
        grid=grid,
        in_specs=[
            pl.BlockSpec((tb, state_size), lambda i: (i, 0)),   # streamed batch tiles
            pl.BlockSpec((state_size, h_pad), resident),
            pl.BlockSpec((1, h_pad), resident),
            pl.BlockSpec((h_pad, h_pad), resident),
            pl.BlockSpec((1, h_pad), resident),
            pl.BlockSpec((h_pad, action_size), resident),
            pl.BlockSpec((1, action_size), resident),
        ],
        out_specs=pl.BlockSpec((tb, action_size), lambda i: (i, 0)),
        compiler_params=pltpu.CompilerParams(
            dimension_semantics=("parallel",),   # 2 TCs on v7x; no-op on v5e/v6e
            vmem_limit_bytes=32 * 1024 * 1024,   # safe on all gens even at tb=2048
        ),
        cost_estimate=pl.CostEstimate(
            flops=flops, transcendentals=0, bytes_accessed=bytes_accessed),
    )(state, w1_p, b1_p, w2_p, b2_p, w3_p, b3_p)


def init_linear_params(key, in_features, out_features):
    """nn.Linear-style init: U(-1/sqrt(fan_in), +1/sqrt(fan_in)); weight as (in, out)."""
    kw, kb = jax.random.split(key)
    bound = 1.0 / (in_features ** 0.5)
    w = jax.random.uniform(kw, (in_features, out_features), jnp.float32,
                           minval=-bound, maxval=bound)
    b = jax.random.uniform(kb, (out_features,), jnp.float32,
                           minval=-bound, maxval=bound)
    return w, b


if __name__ == "__main__":
    batch = 8
    state_size = 16
    hidden_layer_size = 32
    action_size = 4

    key = jax.random.PRNGKey(0)
    k_in, k1, k2, k3 = jax.random.split(key, 4)

    state = jax.random.normal(k_in, (batch, state_size), jnp.float32)
    w1, b1 = init_linear_params(k1, state_size, hidden_layer_size)
    w2, b2 = init_linear_params(k2, hidden_layer_size, hidden_layer_size)
    w3, b3 = init_linear_params(k3, hidden_layer_size, action_size)

    # Pure-JAX f32 reference of the same forward pass.
    def leaky_relu(x):
        return jnp.where(x > 0, x, NEG_SLOPE * x)

    def reference(s):
        r = leaky_relu(s @ w1 + b1)
        r = leaky_relu(r @ w2 + b2)
        return r @ w3 + b3

    ref = reference(state)

    # bf16-matmul path (default; bf16-native MXU on v6e/v7x).
    params_bf16 = prepare_params(w1, b1, w2, b2, w3, b3, use_bf16=True)
    out_bf16 = qnetwork_forward(state, params_bf16)
    jax.block_until_ready(out_bf16)
    assert out_bf16.shape == (batch, action_size)
    assert jnp.allclose(out_bf16, ref, atol=5e-2, rtol=5e-2), "bf16 path mismatch"

    # Exact f32 path.
    params_f32 = prepare_params(w1, b1, w2, b2, w3, b3, use_bf16=False)
    out_f32 = qnetwork_forward(state, params_f32)
    jax.block_until_ready(out_f32)
    assert jnp.allclose(out_f32, ref, atol=1e-5, rtol=1e-5), "f32 path mismatch"

    # Partial-last-block path (odd batch -> 2 grid steps, masked tail rows).
    state13 = jax.random.normal(k_in, (13, state_size), jnp.float32)
    out13 = qnetwork_forward(state13, params_f32)
    jax.block_until_ready(out13)
    assert jnp.allclose(out13, reference(state13), atol=1e-5, rtol=1e-5), \
        "partial-block path mismatch"

    print("KERNEL_OK")
</pallas_src>

<mosaic_0001>
module attributes {stable_mosaic.version = 11 : i64} {
  func.func @qnet_kernel(%arg0: i32, %arg1: memref<8x16xf32, #tpu.memory_space<vmem>>, %arg2: memref<16x128xbf16, #tpu.memory_space<vmem>>, %arg3: memref<1x128xf32, #tpu.memory_space<vmem>>, %arg4: memref<128x128xbf16, #tpu.memory_space<vmem>>, %arg5: memref<1x128xf32, #tpu.memory_space<vmem>>, %arg6: memref<128x4xbf16, #tpu.memory_space<vmem>>, %arg7: memref<1x4xf32, #tpu.memory_space<vmem>>, %arg8: memref<8x4xf32, #tpu.memory_space<vmem>>) attributes {dimension_semantics = [#tpu.dimension_semantics<parallel>], iteration_bounds = array<i64: 1>, scalar_prefetch = 0 : i64, scratch_operands = 0 : i64, tpu.core_type = #tpu.core_type<tc>, window_params = [{transform_indices = @transform_0, window_bounds = array<i64: 8, 16>}, {pipeline_mode = #tpu.pipeline_mode<synchronous>, transform_indices = @transform_1, window_bounds = array<i64: 16, 128>}, {pipeline_mode = #tpu.pipeline_mode<synchronous>, transform_indices = @transform_2, window_bounds = array<i64: 1, 128>}, {pipeline_mode = #tpu.pipeline_mode<synchronous>, transform_indices = @transform_3, window_bounds = array<i64: 128, 128>}, {pipeline_mode = #tpu.pipeline_mode<synchronous>, transform_indices = @transform_4, window_bounds = array<i64: 1, 128>}, {pipeline_mode = #tpu.pipeline_mode<synchronous>, transform_indices = @transform_5, window_bounds = array<i64: 128, 4>}, {pipeline_mode = #tpu.pipeline_mode<synchronous>, transform_indices = @transform_6, window_bounds = array<i64: 1, 4>}, {transform_indices = @transform_7, window_bounds = array<i64: 8, 4>}]} {
    %c0 = arith.constant 0 : index
    %c0_0 = arith.constant 0 : index
    %0 = vector.load %arg1[%c0, %c0_0] : memref<8x16xf32, #tpu.memory_space<vmem>>, vector<8x16xf32>
    %1 = arith.truncf %0 : vector<8x16xf32> to vector<8x16xbf16>
    %c0_1 = arith.constant 0 : index
    %c0_2 = arith.constant 0 : index
    %2 = vector.load %arg2[%c0_1, %c0_2] : memref<16x128xbf16, #tpu.memory_space<vmem>>, vector<16x128xbf16>
    %cst = arith.constant dense<0.000000e+00> : vector<8x128xf32>
    %3 = tpu.matmul %1, %2, %cst {dimension_numbers = #tpu.dot_dimension_numbers<[1], [0], [0], [1], [0, 0, 1, 1], [], []>} : vector<8x16xbf16>, vector<16x128xbf16>, vector<8x128xf32> -> vector<8x128xf32>
    %c0_3 = arith.constant 0 : index
    %c0_4 = arith.constant 0 : index
    %4 = vector.load %arg3[%c0_3, %c0_4] : memref<1x128xf32, #tpu.memory_space<vmem>>, vector<1x128xf32>
    %5 = vector.broadcast %4 : vector<1x128xf32> to vector<8x128xf32>
    %6 = arith.addf %3, %5 : vector<8x128xf32>
    %cst_5 = arith.constant 0.000000e+00 : f32
    %7 = vector.broadcast %cst_5 : f32 to vector<8x128xf32>
    %8 = arith.cmpf ogt, %6, %7 : vector<8x128xf32>
    %cst_6 = arith.constant 0.00999999977 : f32
    %9 = vector.broadcast %cst_6 : f32 to vector<8x128xf32>
    %10 = arith.mulf %9, %6 : vector<8x128xf32>
    %11 = arith.select %8, %6, %10 : vector<8x128xi1>, vector<8x128xf32>
    %12 = arith.truncf %11 : vector<8x128xf32> to vector<8x128xbf16>
    %c0_7 = arith.constant 0 : index
    %c0_8 = arith.constant 0 : index
    %13 = vector.load %arg4[%c0_7, %c0_8] : memref<128x128xbf16, #tpu.memory_space<vmem>>, vector<128x128xbf16>
    %cst_9 = arith.constant dense<0.000000e+00> : vector<8x128xf32>
    %14 = tpu.matmul %12, %13, %cst_9 {dimension_numbers = #tpu.dot_dimension_numbers<[1], [0], [0], [1], [0, 0, 1, 1], [], []>} : vector<8x128xbf16>, vector<128x128xbf16>, vector<8x128xf32> -> vector<8x128xf32>
    %c0_10 = arith.constant 0 : index
    %c0_11 = arith.constant 0 : index
    %15 = vector.load %arg5[%c0_10, %c0_11] : memref<1x128xf32, #tpu.memory_space<vmem>>, vector<1x128xf32>
    %16 = vector.broadcast %15 : vector<1x128xf32> to vector<8x128xf32>
    %17 = arith.addf %14, %16 : vector<8x128xf32>
    %cst_12 = arith.constant 0.000000e+00 : f32
    %18 = vector.broadcast %cst_12 : f32 to vector<8x128xf32>
    %19 = arith.cmpf ogt, %17, %18 : vector<8x128xf32>
    %cst_13 = arith.constant 0.00999999977 : f32
    %20 = vector.broadcast %cst_13 : f32 to vector<8x128xf32>
    %21 = arith.mulf %20, %17 : vector<8x128xf32>
    %22 = arith.select %19, %17, %21 : vector<8x128xi1>, vector<8x128xf32>
    %23 = arith.truncf %22 : vector<8x128xf32> to vector<8x128xbf16>
    %c0_14 = arith.constant 0 : index
    %c0_15 = arith.constant 0 : index
    %24 = vector.load %arg6[%c0_14, %c0_15] : memref<128x4xbf16, #tpu.memory_space<vmem>>, vector<128x4xbf16>
    %cst_16 = arith.constant dense<0.000000e+00> : vector<8x4xf32>
    %25 = tpu.matmul %23, %24, %cst_16 {dimension_numbers = #tpu.dot_dimension_numbers<[1], [0], [0], [1], [0, 0, 1, 1], [], []>} : vector<8x128xbf16>, vector<128x4xbf16>, vector<8x4xf32> -> vector<8x4xf32>
    %c0_17 = arith.constant 0 : index
    %c0_18 = arith.constant 0 : index
    %26 = vector.load %arg7[%c0_17, %c0_18] : memref<1x4xf32, #tpu.memory_space<vmem>>, vector<1x4xf32>
    %27 = vector.broadcast %26 : vector<1x4xf32> to vector<8x4xf32>
    %28 = arith.addf %25, %27 : vector<8x4xf32>
    %c0_19 = arith.constant 0 : index
    %c0_20 = arith.constant 0 : index
    %29 = vector.load %arg8[%c0_19, %c0_20] : memref<8x4xf32, #tpu.memory_space<vmem>>, vector<8x4xf32>
    tpu.vector_store %arg8[%c0_19, %c0_20], %28 {strides = array<i32>} : memref<8x4xf32, #tpu.memory_space<vmem>>, vector<8x4xf32>,
    return
  }
  func.func @transform_0(%arg0: i32) -> (i32, i32) {
    %c0_i32 = arith.constant 0 : i32
    %c0_i32_0 = arith.constant 0 : i32
    return %arg0, %c0_i32 : i32, i32
  }
  func.func @transform_1(%arg0: i32) -> (i32, i32) {
    %c0_i32 = arith.constant 0 : i32
    %c0_i32_0 = arith.constant 0 : i32
    %c0_i32_1 = arith.constant 0 : i32
    return %c0_i32, %c0_i32_0 : i32, i32
  }
  func.func @transform_2(%arg0: i32) -> (i32, i32) {
    %c0_i32 = arith.constant 0 : i32
    %c0_i32_0 = arith.constant 0 : i32
    %c0_i32_1 = arith.constant 0 : i32
    return %c0_i32, %c0_i32_0 : i32, i32
  }
  func.func @transform_3(%arg0: i32) -> (i32, i32) {
    %c0_i32 = arith.constant 0 : i32
    %c0_i32_0 = arith.constant 0 : i32
    %c0_i32_1 = arith.constant 0 : i32
    return %c0_i32, %c0_i32_0 : i32, i32
  }
  func.func @transform_4(%arg0: i32) -> (i32, i32) {
    %c0_i32 = arith.constant 0 : i32
    %c0_i32_0 = arith.constant 0 : i32
    %c0_i32_1 = arith.constant 0 : i32
    return %c0_i32, %c0_i32_0 : i32, i32
  }
  func.func @transform_5(%arg0: i32) -> (i32, i32) {
    %c0_i32 = arith.constant 0 : i32
    %c0_i32_0 = arith.constant 0 : i32
    %c0_i32_1 = arith.constant 0 : i32
    return %c0_i32, %c0_i32_0 : i32, i32
  }
  func.func @transform_6(%arg0: i32) -> (i32, i32) {
    %c0_i32 = arith.constant 0 : i32
    %c0_i32_0 = arith.constant 0 : i32
    %c0_i32_1 = arith.constant 0 : i32
    return %c0_i32, %c0_i32_0 : i32, i32
  }
  func.func @transform_7(%arg0: i32) -> (i32, i32) {
    %c0_i32 = arith.constant 0 : i32
    %c0_i32_0 = arith.constant 0 : i32
    return %arg0, %c0_i32 : i32, i32
  }
}

</mosaic_0001>

<bundles_post_ra>
// kernel: tpu_custom_call.1
= control target key start
LH: loop header
LB: loop body
LE: loop exit
PB: predicated region body
PF: predicated region fallthrough
CT: control target
= control target key end

     0   :  { %12 = vsyncpa [#allocation3], 0  ;;  %s472_s24 = smov [#allocation2]   ;;  %s612_s0 = inlined_call_operand.vmem [shape: f32[8,16], index: 0, kind: input, shape index: {}]   ;;  %s613_s1 = inlined_call_operand.hbm [shape: bf16[16,128], index: 1, kind: input, shape index: {}]   ;;  %s614_s2 = inlined_call_operand.vmem [shape: f32[1,128], index: 2, kind: input, shape index: {}]   ;;  %s615_s3 = inlined_call_operand.vmem [shape: bf16[128,128], index: 3, kind: input, shape index: {}]   ;;  %s616_s4 = inlined_call_operand.vmem [shape: f32[1,128], index: 4, kind: input, shape index: {}]   ;;  %s617_s5 = inlined_call_operand.vmem [shape: bf16[128,4], index: 5, kind: input, shape index: {}]   ;;  %s618_s6 = inlined_call_operand.vmem [shape: f32[1,4], index: 6, kind: input, shape index: {}]   ;;  %s619_s7 = inlined_call_operand.vmem [shape: f32[8,4], index: 7, kind: output, shape index: {}]  }
   0x1   :  { %s20_s25 = sshll.u32 %s472_s24, 4  ;;  %s448_s28 = scalar_lea.hbm %s613_s1, 128  ;;  %s21_s25 = int_to_ptr.vmem [resolvable:$true] %s20_s25 }
   0x2   :  { %p449_p0 = scmp.ne.s32.totalorder %s613_s1, %s448_s28  ;;  %p452_p1 = scmp.lt.u32.totalorder %s448_s28, %s613_s1 }
   0x4   :  { %p454_p2 = pnand %p452_p1, %p449_p0 }
   0x6   :  { %457 = shalt.err (!%p454_p2)
}
   0x7   :  { %s458_s10 = scalar_lea.vmem %s21_s25, 128  ;;  %p463_p4 = scmp.lt.s32.totalorder %s21_s25, %s21_s25 }
   0x8   :  { %p459_p3 = scmp.ne.s32.totalorder %s21_s25, %s458_s10  ;;  %p464_p5 = scmp.lt.s32.totalorder %s458_s10, %s458_s10 }
   0xa   :  { %p465_p6 = por %p464_p5, %p463_p4 }
   0xc   :  { %p466_p7 = pnand %p465_p6, %p459_p3 }
   0xe   :  { %469 = shalt.err (!%p466_p7)
}
   0xf   :  { %s473_s11 = smov 64   ;;  %s474_s12 = smov 4  }
  0x10   :  { %26 = dma.hbm_to_vmem [thread:$0]  %s613_s1, 128, %s21_s25, [#allocation3], %s473_s11, %s473_s11, %s474_s12  }
  0x11   :  { %470 = dma.done.wait [#allocation3], 128  }
  0x12   :  { %471 = vsyncadd [#allocation3], 4294967168  ;;  %v475_v0 = vmov 0.0   ;;  %vm476_vm0 = vmmov 0   ;;  %v431_v1 = vld [vmem:[#allocation2] sm:$0xff]   ;;  %vm58_vm1 = vcmask 130048  }
  0x13   :  { %380 = vmatprep.subr.bf16.mxu0 %v475_v0  ;;  %382 = vmatprep.mubr.msk.bf16.mxu0 %vm476_vm0, %v475_v0  ;;  %v41_v2 = vld [vmem:[%s612_s0] sm:$0xff]  ;;  %v433_v5 = vld [vmem:[%s615_s3 + $0x8] sm:$0xff]   ;;  %v434_v6 = vld [vmem:[%s615_s3 + $0x10] sm:$0xff]   ;;  %vm332_vm4 = vcmask 31744  }
  0x14   :  { %386 = vmatprep.subr.bf16.mxu1 %v475_v0  ;;  %402 = vmatprep.mubr.msk.bf16.mxu1 %vm476_vm0, %v475_v0  ;;  %v42_v3 = vpack.c.bf16 %v41_v2, %v41_v2  ;;  %v432_v4 = vld [vmem:[%s615_s3] sm:$0xff]   ;;  %v435_v7 = vld [vmem:[%s615_s3 + $0x18] sm:$0xff]   ;;  %v437_v9 = vld [vmem:[%s615_s3 + $0x28] sm:$0xff]  }
  0x15   :  { %381 = vmatpush3.bf16.msra.mxu0 %v431_v1  ;;  %387 = vmatpush3.bf16.msra.mxu1 %v432_v4  ;;  %v436_v8 = vld [vmem:[%s615_s3 + $0x20] sm:$0xff]   ;;  %v438_v10 = vld [vmem:[%s615_s3 + $0x30] sm:$0xff]   ;;  %v439_v11 = vld [vmem:[%s615_s3 + $0x38] sm:$0xff]  }
  0x16   :  { %406 = vmatprep.subr.bf16.mxu0 %v475_v0  ;;  %388 = vmatprep.subr.bf16.mxu1 %v475_v0  ;;  %v440_v12 = vld [vmem:[%s617_s5] sm:$0xff]   ;;  %v441_v13 = vld [vmem:[%s617_s5 + $0x8] sm:$0xff]   ;;  %v442_v14 = vld [vmem:[%s617_s5 + $0x10] sm:$0xff]  }
  0x17   :  { %v443_v15 = vld [vmem:[%s617_s5 + $0x18] sm:$0xff]   ;;  %v444_v16 = vld [vmem:[%s617_s5 + $0x20] sm:$0xff]   ;;  %v445_v17 = vld [vmem:[%s617_s5 + $0x28] sm:$0xff]  }
  0x18   :  { %383 = vmatmul.mubr.msk.bf16.vlgmr.msra.gmra.mrb[0].mxu0 %vm58_vm1, %v42_v3  ;;  %v339_v18 = vld [vmem:[%s614_s2] ss:$0 sm:$0xff]  ;;  %v446_v27 = vld [vmem:[%s617_s5 + $0x30] sm:$0xff]   ;;  %v447_v28 = vld [vmem:[%s617_s5 + $0x38] sm:$0xff]  }
  0x19   :  { %422 = vmatprep.mubr.msk.bf16.mxu0 %vm476_vm0, %v475_v0  ;;  %389 = vmatpush3.bf16.msra.mxu1 %v433_v5  ;;  %v342_v29 = vld [vmem:[%s616_s4] ss:$0 sm:$0xff] }
  0x1a   :  { %390 = vmatprep.subr.bf16.mxu1 %v475_v0  ;;  %407 = vmatpush3.bf16.msra.mxu0 %v440_v12  ;;  %v351_v38 = vld [vmem:[%s618_s6] ss:$0 sm:$0xff] }
  0x1b   :  { %408 = vmatprep.subr.bf16.mxu0 %v475_v0 }
  0x1d   :  { %391 = vmatpush3.bf16.msra.mxu1 %v434_v6 }
  0x1e   :  { %392 = vmatprep.subr.bf16.mxu1 %v475_v0  ;;  %409 = vmatpush3.bf16.msra.mxu0 %v441_v13 }
  0x1f   :  { %410 = vmatprep.subr.bf16.mxu0 %v475_v0 }
  0x21   :  { %393 = vmatpush3.bf16.msra.mxu1 %v435_v7 }
  0x22   :  { %394 = vmatprep.subr.bf16.mxu1 %v475_v0  ;;  %411 = vmatpush3.bf16.msra.mxu0 %v442_v14 }
  0x23   :  { %412 = vmatprep.subr.bf16.mxu0 %v475_v0 }
  0x25   :  { %395 = vmatpush3.bf16.msra.mxu1 %v436_v8 }
  0x26   :  { %396 = vmatprep.subr.bf16.mxu1 %v475_v0  ;;  %413 = vmatpush3.bf16.msra.mxu0 %v443_v15 }
  0x27   :  { %414 = vmatprep.subr.bf16.mxu0 %v475_v0 }
  0x29   :  { %397 = vmatpush3.bf16.msra.mxu1 %v437_v9 }
  0x2a   :  { %398 = vmatprep.subr.bf16.mxu1 %v475_v0  ;;  %415 = vmatpush3.bf16.msra.mxu0 %v444_v16 }
  0x2b   :  { %416 = vmatprep.subr.bf16.mxu0 %v475_v0 }
  0x2d   :  { %399 = vmatpush3.bf16.msra.mxu1 %v438_v10 }
  0x2e   :  { %400 = vmatprep.subr.bf16.mxu1 %v475_v0  ;;  %417 = vmatpush3.bf16.msra.mxu0 %v445_v17 }
  0x2f   :  { %418 = vmatprep.subr.bf16.mxu0 %v475_v0 }
  0x31   :  { %401 = vmatpush3.bf16.msra.mxu1 %v439_v11 }
  0x32   :  { %419 = vmatpush3.bf16.msra.mxu0 %v446_v27 }
  0x33   :  { %420 = vmatprep.subr.bf16.mxu0 %v475_v0 }
  0x36   :  { %421 = vmatpush3.bf16.msra.mxu0 %v447_v28 }
  0xeb   :  { %v96_v19 = vpop.f32.mrb[0].mxu0 }
  0xec   :  { %v97_v20 = vadd.f32 %v339_v18, %v96_v19  ;;  %v384_v21 = vpop.f32.mrb[1].mxu0 }
  0xed   :  { %v99_v22 = vpop.f32.mrb[2].mxu0 }
  0xee   :  { %vm102_vm2 = vcmp.gt.f32.partialorder %v97_v20, 0.0  ;;  %v103_v23 = vmul.f32 0.01, %v97_v20  ;;  %v385_v24 = vpop.f32.mrb[3].mxu0 }
  0xf0   :  { %v104_v25 = vsel %vm102_vm2, %v97_v20, %v103_v23 }
  0xf1   :  { %v105_v26 = vpack.c.bf16 %v104_v25, %v104_v25 }
  0xf3   :  { %403 = vmatmul.mubr.bf16.vlgmr.msra.gmra.mrb[0].mxu1 %v105_v26 }
 0x1c6   :  { %v211_v30 = vpop.f32.mrb[0].mxu1 }
 0x1c7   :  { %v212_v31 = vadd.f32 %v342_v29, %v211_v30  ;;  %v404_v32 = vpop.f32.mrb[1].mxu1 }
 0x1c8   :  { %v214_v33 = vpop.f32.mrb[2].mxu1 }
 0x1c9   :  { %vm217_vm3 = vcmp.gt.f32.partialorder %v212_v31, 0.0  ;;  %v218_v34 = vmul.f32 0.01, %v212_v31  ;;  %v405_v35 = vpop.f32.mrb[3].mxu1 }
 0x1cb   :  { %v219_v36 = vsel %vm217_vm3, %v212_v31, %v218_v34 }
 0x1cc   :  { %v220_v37 = vpack.c.bf16 %v219_v36, %v219_v36 }
 0x1ce   :  { %423 = vmatmul.mubr.bf16.vlgmr.msra.gmra.mrb[4].mxu0 %v220_v37 }
 0x2a1   :  { %v326_v39 = vpop.f32.mrb[4].mxu0 }
 0x2a2   :  { %v327_v40 = vadd.f32 %v351_v38, %v326_v39  ;;  %v424_v41 = vpop.f32.mrb[5].mxu0 }
 0x2a3   :  { %v329_v42 = vpop.f32.mrb[6].mxu0 }
 0x2a4   :  { %333 = vst.msk [vmem:[%s619_s7] sm:$0xff] %vm332_vm4, %v327_v40  ;;  %v425_v43 = vpop.f32.mrb[7].mxu0 }
 0x2a5   :  { %338 = vsyncpa [#allocation3], 1 }

</bundles_post_ra>
